<compile_context>
chip_gen: v6e
topology: v6e:2x2x1
jax: 0.10.0
libtpu: 0.0.40
codegen_flags: <defaults>
</compile_context>

<pallas_src>
import math

import jax
import jax.numpy as jnp
from jax.experimental import pallas as pl
from jax.experimental.pallas import tpu as pltpu


def _layerscale_kernel(x_ref, gamma_ref, o_ref):
    # x_ref:     (tile_rows, tile_d) VMEM tile, input dtype
    # gamma_ref: (1, tile_d)         VMEM tile, float32 (resident across the row sweep)
    # o_ref:     (tile_rows, tile_d) VMEM tile, input dtype
    x = x_ref[...].astype(jnp.float32)
    o_ref[...] = (x * gamma_ref[...]).astype(o_ref.dtype)


def layer_scale(x: jax.Array, gamma: jax.Array, *, target_block_bytes: int | None = None) -> jax.Array:
    """Applies y = x * gamma with gamma (D,) broadcast over the last dim of x (..., D)."""
    orig_shape = x.shape
    D = orig_shape[-1]
    assert gamma.shape == (D,)
    dtype = x.dtype
    itemsize = jnp.dtype(dtype).itemsize
    rows = math.prod(orig_shape[:-1])

    gamma_f32 = gamma.astype(jnp.float32)

    # --- Present a lane-dense (last dim multiple of 128) 2-D slab when possible ---
    L = (D * 128) // math.gcd(D, 128)  # lcm(D, 128)
    if D % 128 == 0:
        slab_rows, slab_cols = rows, D
        gamma_row = gamma_f32.reshape(1, D)
    elif L <= 4096 and (rows * D) % L == 0:
        # Fold logical rows so the lane dim becomes L (a multiple of 128); since L % D == 0,
        # column c of the folded slab corresponds to feature c % D -> tile gamma L/D times.
        slab_rows, slab_cols = (rows * D) // L, L
        gamma_row = jnp.tile(gamma_f32, L // D).reshape(1, L)
    else:
        # Fallback: full-D blocks (last block dim == full array dim is always legal,
        # stores may be masked). Rare for transformer widths.
        slab_rows, slab_cols = rows, D
        gamma_row = gamma_f32.reshape(1, D)

    x2 = x.reshape(slab_rows, slab_cols)
    slab_bytes = slab_rows * slab_cols * itemsize

    # --- Per-chip VMEM budget; clamp the tile to the budget, not just the limit ---
    try:
        vmem_capacity = int(pltpu.get_tpu_info().vmem_capacity_bytes)
    except Exception:
        vmem_capacity = 64 << 20  # conservative fallback (v7x per-TC physical)
    vmem_budget = (vmem_capacity * 3) // 4  # leave ~25% headroom for internal scratch

    gamma_bytes = slab_cols * 4
    headroom = 2 << 20
    # 4 big buffers live at once: (x in + o out) x double-buffered.
    max_block_bytes = max(64 * 1024, (vmem_budget - 2 * gamma_bytes - headroom) // 4)
    if target_block_bytes is None:
        target_block_bytes = 8 * 1024 * 1024  # bigger default helps v7x's faster HBM
    target_block_bytes = min(target_block_bytes, max_block_bytes)

    # --- Tile the feature dim only when it is very wide ---
    MAX_TILE_D = 4096  # multiple of 128
    tile_d = slab_cols if slab_cols <= MAX_TILE_D else MAX_TILE_D

    # --- Row tile sized by bytes, aligned to the dtype's sublane packing ---
    align = max(8, 32 // itemsize)  # 8 for f32, 16 for bf16, 32 for int8/fp8
    bytes_per_row = tile_d * itemsize
    tile_rows = max(align, (target_block_bytes // bytes_per_row) // align * align)

    # Never collapse to a single block on slabs worth pipelining.
    if slab_bytes > (4 << 20):
        min_row_blocks = 4  # 2 TensorCores (v7x megacore) x double-buffer
    elif slab_bytes > (1 << 20):
        min_row_blocks = 2  # overlap output writeback with next input fetch
    else:
        min_row_blocks = 1
    if min_row_blocks > 1:
        cap = max(align, (pl.cdiv(slab_rows, min_row_blocks) // align) * align)
        tile_rows = min(tile_rows, cap)
    if tile_rows >= slab_rows:
        tile_rows = slab_rows  # full extent (no row raggedness, any row count legal)

    row_blocks = pl.cdiv(slab_rows, tile_rows)
    col_blocks = pl.cdiv(slab_cols, tile_d)

    # --- VMEM limit: sized from the (already budget-clamped) blocks ---
    block_bytes = tile_rows * tile_d * itemsize
    vmem_needed = 2 * 2 * block_bytes + 2 * tile_d * 4 + headroom
    vmem_limit = int(min(max(vmem_needed, 16 << 20), vmem_budget))

    n_elems = slab_rows * slab_cols
    cost = pl.CostEstimate(
        flops=n_elems,
        transcendentals=0,
        bytes_accessed=2 * n_elems * itemsize + D * 4,
    )

    if col_blocks == 1:
        # Common case: 1-D grid over rows, gamma block fixed -> resident in VMEM.
        grid = (row_blocks,)
        in_specs = [
            pl.BlockSpec((tile_rows, tile_d), lambda i: (i, 0)),
            pl.BlockSpec((1, tile_d), lambda i: (0, 0)),
        ]
        out_specs = pl.BlockSpec((tile_rows, tile_d), lambda i: (i, 0))
        dim_sem = ("parallel",)
    else:
        # Wide-D case: column axis OUTER so gamma's block index is constant over the
        # inner (row) sweep and isn't re-fetched every step.
        grid = (col_blocks, row_blocks)
        in_specs = [
            pl.BlockSpec((tile_rows, tile_d), lambda j, i: (i, j)),
            pl.BlockSpec((1, tile_d), lambda j, i: (0, j)),
        ]
        out_specs = pl.BlockSpec((tile_rows, tile_d), lambda j, i: (i, j))
        dim_sem = ("parallel", "parallel")

    out = pl.pallas_call(
        _layerscale_kernel,
        out_shape=jax.ShapeDtypeStruct((slab_rows, slab_cols), dtype),
        grid_spec=pltpu.PrefetchScalarGridSpec(
            num_scalar_prefetch=0,
            grid=grid,
            in_specs=in_specs,
            out_specs=out_specs,
        ),
        compiler_params=pltpu.CompilerParams(
            dimension_semantics=dim_sem,
            vmem_limit_bytes=vmem_limit,
        ),
        cost_estimate=cost,
    )(x2, gamma_row)

    return out.reshape(orig_shape)


if __name__ == "__main__":
    key = jax.random.PRNGKey(0)

    # Primary demo: batch=2, seq=8, hidden(dim)=32, matching the nn.Module init.
    B, S, D = 2, 8, 32
    init_val = 1e-5

    x = jax.random.normal(key, (B, S, D), dtype=jnp.float32)
    gamma = init_val * jnp.ones((D,), dtype=jnp.float32)  # nn.Parameter(init_val * ones(dim))

    y = layer_scale(x, gamma)
    jax.block_until_ready(y)

    ref = x * gamma
    assert y.shape == x.shape and y.dtype == x.dtype
    assert jnp.allclose(y, ref, rtol=1e-6, atol=1e-6)

    # Check 2: bf16, D multiple of 128, tiny block budget forces a ragged multi-block
    # row grid (exercises pipelining + the partial last block).
    k2 = jax.random.PRNGKey(1)
    x3 = jax.random.normal(k2, (3, 10, 256), dtype=jnp.bfloat16)
    gamma3 = jax.random.normal(jax.random.PRNGKey(2), (256,), dtype=jnp.float32)
    y3 = layer_scale(x3, gamma3, target_block_bytes=8 * 1024)
    jax.block_until_ready(y3)
    ref3 = (x3.astype(jnp.float32) * gamma3).astype(jnp.bfloat16)
    assert y3.shape == x3.shape and y3.dtype == x3.dtype
    assert jnp.allclose(y3.astype(jnp.float32), ref3.astype(jnp.float32), rtol=1e-2, atol=1e-2)

    # Check 3: D=96 exercises the generalized lcm fold (L = lcm(96,128) = 384).
    x4 = jax.random.normal(jax.random.PRNGKey(3), (2, 8, 96), dtype=jnp.float32)
    gamma4 = jax.random.normal(jax.random.PRNGKey(4), (96,), dtype=jnp.float32)
    y4 = layer_scale(x4, gamma4)
    jax.block_until_ready(y4)
    assert jnp.allclose(y4, x4 * gamma4, rtol=1e-6, atol=1e-6)

    print("KERNEL_OK")
</pallas_src>

<mosaic_0001>
module attributes {stable_mosaic.version = 11 : i64} {
  func.func @_layerscale_kernel(%arg0: i32, %arg1: memref<4x128xf32, #tpu.memory_space<vmem>>, %arg2: memref<1x128xf32, #tpu.memory_space<vmem>>, %arg3: memref<4x128xf32, #tpu.memory_space<vmem>>) attributes {dimension_semantics = [#tpu.dimension_semantics<parallel>], iteration_bounds = array<i64: 1>, scalar_prefetch = 0 : i64, scratch_operands = 0 : i64, tpu.core_type = #tpu.core_type<tc>, window_params = [{transform_indices = @transform_0, window_bounds = array<i64: 4, 128>}, {pipeline_mode = #tpu.pipeline_mode<synchronous>, transform_indices = @transform_1, window_bounds = array<i64: 1, 128>}, {transform_indices = @transform_2, window_bounds = array<i64: 4, 128>}]} {
    %c0 = arith.constant 0 : index
    %c0_0 = arith.constant 0 : index
    %0 = vector.load %arg1[%c0, %c0_0] : memref<4x128xf32, #tpu.memory_space<vmem>>, vector<4x128xf32>
    %c0_1 = arith.constant 0 : index
    %c0_2 = arith.constant 0 : index
    %1 = vector.load %arg2[%c0_1, %c0_2] : memref<1x128xf32, #tpu.memory_space<vmem>>, vector<1x128xf32>
    %2 = vector.broadcast %1 : vector<1x128xf32> to vector<4x128xf32>
    %3 = arith.mulf %0, %2 : vector<4x128xf32>
    %c0_3 = arith.constant 0 : index
    %c0_4 = arith.constant 0 : index
    %4 = vector.load %arg3[%c0_3, %c0_4] : memref<4x128xf32, #tpu.memory_space<vmem>>, vector<4x128xf32>
    tpu.vector_store %arg3[%c0_3, %c0_4], %3 {strides = array<i32>} : memref<4x128xf32, #tpu.memory_space<vmem>>, vector<4x128xf32>,
    return
  }
  func.func @transform_0(%arg0: i32) -> (i32, i32) {
    %c0_i32 = arith.constant 0 : i32
    %c0_i32_0 = arith.constant 0 : i32
    return %arg0, %c0_i32 : i32, i32
  }
  func.func @transform_1(%arg0: i32) -> (i32, i32) {
    %c0_i32 = arith.constant 0 : i32
    %c0_i32_0 = arith.constant 0 : i32
    %c0_i32_1 = arith.constant 0 : i32
    return %c0_i32, %c0_i32_0 : i32, i32
  }
  func.func @transform_2(%arg0: i32) -> (i32, i32) {
    %c0_i32 = arith.constant 0 : i32
    %c0_i32_0 = arith.constant 0 : i32
    return %arg0, %c0_i32 : i32, i32
  }
}

</mosaic_0001>

<bundles_post_ra>
// kernel: tpu_custom_call.1
= control target key start
LH: loop header
LB: loop body
LE: loop exit
PB: predicated region body
PF: predicated region fallthrough
CT: control target
= control target key end

     0   :  { %7 = vsyncpa [#allocation3], 0  ;;  %s122_s0 = inlined_call_operand.hbm [shape: f32[4,128], index: 0, kind: input, shape index: {}]   ;;  %s123_s1 = inlined_call_operand.vmem [shape: f32[1,128], index: 1, kind: input, shape index: {}]   ;;  %s124_s2 = inlined_call_operand.hbm [shape: f32[4,128], index: 2, kind: output, shape index: {}]  }
   0x1   :  { %8 = vsyncpa [#allocation4], 0  ;;  %s96_s9 = smov [#allocation2]  }
   0x2   :  { %s15_s10 = sshll.u32 %s96_s9, 4  ;;  %s16_s10 = int_to_ptr.vmem [resolvable:$true] %s15_s10 }
   0x3   :  { %s60_s11 = scalar_lea.vmem %s16_s10, 64  ;;  %p65_p1 = scmp.lt.s32.totalorder %s16_s10, %s16_s10 }
   0x4   :  { %p61_p0 = scmp.ne.s32.totalorder %s16_s10, %s60_s11  ;;  %p66_p2 = scmp.lt.s32.totalorder %s60_s11, %s60_s11 }
   0x6   :  { %p67_p3 = por %p66_p2, %p65_p1 }
   0x8   :  { %p68_p4 = pnand %p67_p3, %p61_p0 }
   0xa   :  { %71 = shalt.err (!%p68_p4)
}
   0xb   :  { %18 = dma.hbm_to_vmem [thread:$0]  %s122_s0, 64, %s16_s10, [#allocation3]  }
   0xc   :  { %92 = dma.done.wait [#allocation3], 64  }
   0xd   :  { %93 = vsyncadd [#allocation3], 4294967232  ;;  %s97_s14 = smov [#allocation5]   ;;  %v24_v0 = vld [vmem:[#allocation2] sm:$0xf] }
   0xe   :  { %s40_s15 = sshll.u32 %s97_s14, 4  ;;  %v49_v1 = vld [vmem:[%s123_s1] ss:$0 sm:$0xff]  ;;  %s41_s15 = int_to_ptr.vmem [resolvable:$true] %s40_s15 }
   0xf   :  { %v32_v2 = vmul.f32 %v49_v1, %v24_v0  ;;  %s72_s18 = scalar_lea.vmem %s41_s15, 64  ;;  %p77_p6 = scmp.lt.s32.totalorder %s41_s15, %s41_s15 }
  0x10   :  { %p73_p5 = scmp.ne.s32.totalorder %s41_s15, %s72_s18  ;;  %p78_p7 = scmp.lt.s32.totalorder %s72_s18, %s72_s18 }
  0x11   :  { %33 = vst [vmem:[#allocation5] sm:$0xf] %v32_v2 }
  0x12   :  { %p79_p8 = por %p78_p7, %p77_p6 }
  0x14   :  { %p80_p9 = pnand %p79_p8, %p73_p5 }
  0x16   :  { %83 = shalt.err (!%p80_p9)
}
  0x17   :  { %43 = dma.vmem_to_hbm [thread:$0]  %s41_s15, 64, %s124_s2, [#allocation4]  }
  0x18   :  { %94 = dma.done.wait [#allocation4], 64  }
  0x19   :  { %95 = vsyncadd [#allocation4], 4294967232 }
  0x1a   :  { %47 = vsyncpa [#allocation3], 1 }
  0x1b   :  { %48 = vsyncpa [#allocation4], 1 }

</bundles_post_ra>
